<compile_context>
chip_gen: v6e
topology: v6e:2x2x1
jax: 0.10.0
libtpu: 0.0.40
codegen_flags: <defaults>
</compile_context>

<pallas_src>
import math

import jax
import jax.numpy as jnp
import numpy as np
from jax.experimental import pallas as pl
from jax.experimental.pallas import tpu as pltpu


def _add_pe_kernel(x_ref, pe_ref, o_ref):
    # x tile (TB, TC) + pe tile (1, TC) -> broadcast add over the batch rows.
    o_ref[...] = x_ref[...] + pe_ref[...]


def make_pos_enc(d_model: int, max_seq_len: int = 6) -> jnp.ndarray:
    """Build the sinusoidal table exactly as the PyTorch __init__ does."""
    # TODO(synk): like the PyTorch original, this assumes an even d_model.
    pos = jnp.arange(0, max_seq_len, dtype=jnp.float32)[:, None]           # (L, 1)
    div_term = jnp.exp(
        jnp.arange(0, d_model, 2, dtype=jnp.float32)
        * (-math.log(10000.0) / d_model)
    )                                                                       # (D/2,)
    angles = pos * div_term                                                 # (L, D/2)
    pe = jnp.zeros((max_seq_len, d_model), dtype=jnp.float32)
    pe = pe.at[:, 0::2].set(jnp.sin(angles))
    pe = pe.at[:, 1::2].set(jnp.cos(angles))
    return pe[None, :, :]                                                   # (1, L, D)


def _choose_blocks(B: int, row: int, itemsize: int, target_bytes: int = 2 << 20):
    """Pick (batch_block, col_block) for the flattened (B, S*D) view.

    Keeps each x tile <= ~target_bytes so the double-buffered pipeline
    footprint (x in + out + pe, 2 buffers each) fits the default scoped-VMEM
    limit on v5e (16 MiB), v6e (32 MiB) and v7x (32 MiB of 64 MiB physical).
    """
    sub = 8 * max(1, 4 // itemsize)  # sublane multiple: 8 (f32), 16 (bf16), 32 (i8)
    row_bytes = row * itemsize
    rows_fit = (target_bytes // row_bytes) if row_bytes <= target_bytes else 0

    if rows_fit >= B:
        # Whole array in a single block (tiny inputs) -> one grid step.
        return B, row
    if rows_fit >= sub:
        # Stack as many full rows as fit, rounded to the sublane tile.
        return (rows_fit // sub) * sub, row
    # A single row is already bigger than the budget: tile the flattened
    # feature axis too, in multiples of 128 lanes, keeping `sub` rows dense.
    tb = min(B, sub)
    tc = max(128, (target_bytes // (tb * itemsize) // 128) * 128)
    return tb, min(tc, row)


def positional_encoding_forward(x: jnp.ndarray, pos_enc: jnp.ndarray) -> jnp.ndarray:
    """x: (B, S, D); pos_enc: (1, max_seq_len, D). Returns x + pos_enc[:, :S]."""
    B, S, D = x.shape
    row = S * D

    # Glue (same as the PyTorch forward slice), plus a lane-dense 2D view and
    # a dtype match so the kernel does a single native-width add.
    pe = pos_enc[:, :S, :].astype(x.dtype)
    x2 = x.reshape(B, row)
    pe2 = pe.reshape(1, row)

    itemsize = np.dtype(x.dtype).itemsize
    tb, tc = _choose_blocks(B, row, itemsize)
    # Columns outer, batch inner: the pe block index (0, c) is constant over
    # the inner (batch) axis, so the tiny pe tile is fetched once per column
    # block instead of once per grid step.
    grid = (pl.cdiv(row, tc), pl.cdiv(B, tb))

    out2 = pl.pallas_call(
        _add_pe_kernel,
        out_shape=jax.ShapeDtypeStruct((B, row), x.dtype),
        grid_spec=pltpu.PrefetchScalarGridSpec(
            num_scalar_prefetch=0,
            grid=grid,
            in_specs=[
                # x: (tb, tc) tile walking batch rows (inner) and cols (outer).
                pl.BlockSpec((tb, tc), lambda c, b: (b, c)),
                # pe: same column tile for every batch step (broadcast; block
                # index unchanged across the inner axis -> no re-DMA).
                pl.BlockSpec((1, tc), lambda c, b: (0, c)),
            ],
            out_specs=pl.BlockSpec((tb, tc), lambda c, b: (b, c)),
        ),
        compiler_params=pltpu.CompilerParams(
            # Pure elementwise: both grid axes are independent (megacore-able).
            dimension_semantics=("parallel", "parallel"),
        ),
    )(x2, pe2)

    return out2.reshape(B, S, D)


if __name__ == "__main__":
    # Small shapes consistent with the module: d_model=32, max_seq_len=6, seq=4.
    d_model = 32
    max_seq_len = 6
    batch, seq = 2, 4

    key = jax.random.PRNGKey(0)
    x = jax.random.normal(key, (batch, seq, d_model), dtype=jnp.float32)

    pos_enc = make_pos_enc(d_model, max_seq_len)  # deterministic "parameter"

    out = positional_encoding_forward(x, pos_enc)
    out = jax.block_until_ready(out)

    # Reference check (plain JAX broadcast add).
    ref = x + pos_enc[:, :seq, :]
    assert out.shape == (batch, seq, d_model)
    assert jnp.allclose(out, ref, atol=1e-6, rtol=1e-6), "mismatch vs reference"

    print("KERNEL_OK")
</pallas_src>

<mosaic_0001>
module attributes {stable_mosaic.version = 11 : i64} {
  func.func @_add_pe_kernel(%arg0: i32, %arg1: i32, %arg2: memref<2x128xf32, #tpu.memory_space<vmem>>, %arg3: memref<1x128xf32, #tpu.memory_space<vmem>>, %arg4: memref<2x128xf32, #tpu.memory_space<vmem>>) attributes {dimension_semantics = [#tpu.dimension_semantics<parallel>, #tpu.dimension_semantics<parallel>], iteration_bounds = array<i64: 1, 1>, scalar_prefetch = 0 : i64, scratch_operands = 0 : i64, tpu.core_type = #tpu.core_type<tc>, window_params = [{transform_indices = @transform_0, window_bounds = array<i64: 2, 128>}, {transform_indices = @transform_1, window_bounds = array<i64: 1, 128>}, {transform_indices = @transform_2, window_bounds = array<i64: 2, 128>}]} {
    %c0 = arith.constant 0 : index
    %c0_0 = arith.constant 0 : index
    %0 = vector.load %arg2[%c0, %c0_0] : memref<2x128xf32, #tpu.memory_space<vmem>>, vector<2x128xf32>
    %c0_1 = arith.constant 0 : index
    %c0_2 = arith.constant 0 : index
    %1 = vector.load %arg3[%c0_1, %c0_2] : memref<1x128xf32, #tpu.memory_space<vmem>>, vector<1x128xf32>
    %2 = vector.broadcast %1 : vector<1x128xf32> to vector<2x128xf32>
    %3 = arith.addf %0, %2 : vector<2x128xf32>
    %c0_3 = arith.constant 0 : index
    %c0_4 = arith.constant 0 : index
    %4 = vector.load %arg4[%c0_3, %c0_4] : memref<2x128xf32, #tpu.memory_space<vmem>>, vector<2x128xf32>
    tpu.vector_store %arg4[%c0_3, %c0_4], %3 {strides = array<i32>} : memref<2x128xf32, #tpu.memory_space<vmem>>, vector<2x128xf32>,
    return
  }
  func.func @transform_0(%arg0: i32, %arg1: i32) -> (i32, i32) {
    %c0_i32 = arith.constant 0 : i32
    return %arg1, %arg0 : i32, i32
  }
  func.func @transform_1(%arg0: i32, %arg1: i32) -> (i32, i32) {
    %c0_i32 = arith.constant 0 : i32
    %c0_i32_0 = arith.constant 0 : i32
    return %c0_i32, %arg0 : i32, i32
  }
  func.func @transform_2(%arg0: i32, %arg1: i32) -> (i32, i32) {
    %c0_i32 = arith.constant 0 : i32
    return %arg1, %arg0 : i32, i32
  }
}

</mosaic_0001>

<bundles_post_ra>
// kernel: tpu_custom_call.1
= control target key start
LH: loop header
LB: loop body
LE: loop exit
PB: predicated region body
PF: predicated region fallthrough
CT: control target
= control target key end

     0   :  { %7 = vsyncpa [#allocation3], 0  ;;  %s122_s0 = inlined_call_operand.hbm [shape: f32[2,128], index: 0, kind: input, shape index: {}]   ;;  %s123_s1 = inlined_call_operand.vmem [shape: f32[1,128], index: 1, kind: input, shape index: {}]   ;;  %s124_s2 = inlined_call_operand.hbm [shape: f32[2,128], index: 2, kind: output, shape index: {}]  }
   0x1   :  { %8 = vsyncpa [#allocation4], 0  ;;  %s96_s9 = smov [#allocation2]  }
   0x2   :  { %s15_s10 = sshll.u32 %s96_s9, 4  ;;  %s16_s10 = int_to_ptr.vmem [resolvable:$true] %s15_s10 }
   0x3   :  { %s60_s11 = scalar_lea.vmem %s16_s10, 32  ;;  %p65_p1 = scmp.lt.s32.totalorder %s16_s10, %s16_s10 }
   0x4   :  { %p61_p0 = scmp.ne.s32.totalorder %s16_s10, %s60_s11  ;;  %p66_p2 = scmp.lt.s32.totalorder %s60_s11, %s60_s11 }
   0x6   :  { %p67_p3 = por %p66_p2, %p65_p1 }
   0x8   :  { %p68_p4 = pnand %p67_p3, %p61_p0 }
   0xa   :  { %71 = shalt.err (!%p68_p4)
}
   0xb   :  { %18 = dma.hbm_to_vmem [thread:$0]  %s122_s0, 32, %s16_s10, [#allocation3]  }
   0xc   :  { %92 = dma.done.wait [#allocation3], 32  }
   0xd   :  { %93 = vsyncadd [#allocation3], 4294967264  ;;  %s97_s14 = smov [#allocation5]   ;;  %v24_v0 = vld [vmem:[#allocation2] sm:$0x3] }
   0xe   :  { %s40_s15 = sshll.u32 %s97_s14, 4  ;;  %v49_v1 = vld [vmem:[%s123_s1] ss:$0 sm:$0xff]  ;;  %s41_s15 = int_to_ptr.vmem [resolvable:$true] %s40_s15 }
   0xf   :  { %v32_v2 = vadd.f32 %v49_v1, %v24_v0  ;;  %s72_s18 = scalar_lea.vmem %s41_s15, 32  ;;  %p77_p6 = scmp.lt.s32.totalorder %s41_s15, %s41_s15 }
  0x10   :  { %p73_p5 = scmp.ne.s32.totalorder %s41_s15, %s72_s18  ;;  %p78_p7 = scmp.lt.s32.totalorder %s72_s18, %s72_s18 }
  0x11   :  { %33 = vst [vmem:[#allocation5] sm:$0x3] %v32_v2 }
  0x12   :  { %p79_p8 = por %p78_p7, %p77_p6 }
  0x14   :  { %p80_p9 = pnand %p79_p8, %p73_p5 }
  0x16   :  { %83 = shalt.err (!%p80_p9)
}
  0x17   :  { %43 = dma.vmem_to_hbm [thread:$0]  %s41_s15, 32, %s124_s2, [#allocation4]  }
  0x18   :  { %94 = dma.done.wait [#allocation4], 32  }
  0x19   :  { %95 = vsyncadd [#allocation4], 4294967264 }
  0x1a   :  { %47 = vsyncpa [#allocation3], 1 }
  0x1b   :  { %48 = vsyncpa [#allocation4], 1 }

</bundles_post_ra>
